<compile_context>
chip_gen: v7x
topology: tpu7x:2x2x1
jax: 0.10.0
libtpu: 0.0.40
codegen_flags: <defaults>
</compile_context>

<pallas_src>
import jax
import jax.numpy as jnp
from jax import lax
from jax.experimental import pallas as pl
from jax.experimental.pallas import tpu as pltpu

# ---- model hyperparameters (small, consistent with a 4-channel 16x16 input) ----
B, CIN, H, W = 2, 4, 16, 16
COUT = 8
K = 3
NUM_CLASSES = 10
HW = H * W
KKC = K * K * CIN          # 36
KKC_PAD = 40               # next multiple of 8 after KKC+1 (bias row included)


def _fused_model_kernel(p_ref, wc_ref, wf_ref, out_ref):
    """Single invocation, whole problem in VMEM.

    p_ref  : (KKC_PAD, B*HW)       im2col patches (lane-dense), row KKC == 1.0 (bias),
                                    rows KKC+1.. == 0.0 (alignment pad)
    wc_ref : (COUT, KKC_PAD)       conv weight; col KKC == conv bias, pad cols == 0
    wf_ref : (COUT+1, NUM_CLASSES) head weight pre-scaled by 1/(H*W); row COUT == head bias
    out_ref: (B, NUM_CLASSES)      logits
    """
    # Conv (+ bias, folded in) as one lane-dense MXU matmul:
    # (COUT, KKC_PAD) @ (KKC_PAD, B*HW) -> (COUT, B*HW), then ReLU on full-lane vregs.
    feat = jnp.dot(wc_ref[...], p_ref[...], preferred_element_type=jnp.float32)
    feat = jnp.maximum(feat, 0.0)

    # Per-batch pooling selector built in-kernel (no HBM operand): 1.0 where the fused
    # column index j belongs to batch row b.  Compares only (no int division).
    nb = out_ref.shape[0]
    ncols = p_ref.shape[1]
    col = lax.broadcasted_iota(jnp.int32, (nb, ncols), 1)
    lo = lax.broadcasted_iota(jnp.int32, (nb, ncols), 0) * HW
    pool_sel = jnp.logical_and(col >= lo, col < lo + HW).astype(jnp.float32)

    # Per-batch global SUM pool as one MXU contraction over the fused B*HW axis.
    # The 1/(H*W) mean scale is already folded into the head weight.
    pooled = lax.dot_general(
        pool_sel, feat,
        dimension_numbers=(((1,), (1,)), ((), ())),
        preferred_element_type=jnp.float32)                      # (B, COUT)

    # Batched classifier head; weight and bias come from one packed operand.
    wf = wf_ref[pl.ds(0, COUT), :]                               # (COUT, NUM_CLASSES)
    bf = wf_ref[pl.ds(COUT, 1), :]                               # (1, NUM_CLASSES)
    logits = jnp.dot(pooled, wf, preferred_element_type=jnp.float32) + bf
    out_ref[...] = logits.astype(out_ref.dtype)


@jax.jit
def custom_adv_model_forward(x_nchw, wconv, bconv, wfc, bfc):
    """Equivalent of CustomAdvModel(inner_model)(x): runs the inner model.

    x_nchw: (B, CIN, H, W) float32
    wconv : (COUT, CIN, K, K)   (PyTorch OIHW layout)
    bconv : (COUT,)
    wfc   : (NUM_CLASSES, COUT) (PyTorch Linear layout)
    bfc   : (NUM_CLASSES,)
    returns logits (B, NUM_CLASSES)
    """
    b = x_nchw.shape[0]

    # ---- layout plumbing (fused by jit; only the tiny input is transposed) ----
    # Build patches directly in (KKC, B*HW) layout: transpose the 4 KiB input once,
    # pad spatial dims, then stack the nine (kh,kw)-shifted (CIN, B*HW) slabs in
    # (kh, kw, cin) row order — matching the weight reshape below.
    x_cbhw = jnp.transpose(x_nchw, (1, 0, 2, 3))                    # (CIN, B, H, W)
    xp = jnp.pad(x_cbhw, ((0, 0), (0, 0), (1, 1), (1, 1)))          # (CIN, B, H+2, W+2)
    patch_rows = [
        xp[:, :, kh:kh + H, kw:kw + W].reshape(CIN, b * HW)
        for kh in range(K) for kw in range(K)
    ]
    ones_row = jnp.ones((1, b * HW), jnp.float32)                   # conv-bias row
    zero_rows = jnp.zeros((KKC_PAD - KKC - 1, b * HW), jnp.float32)  # alignment pad
    p_aug = jnp.concatenate(patch_rows + [ones_row, zero_rows], axis=0)  # (KKC_PAD, B*HW)

    # conv weight OIHW -> (cout, kh, kw, cin) -> (COUT, KKC); append bias col + zero pad.
    wc_t = jnp.transpose(wconv, (0, 2, 3, 1)).reshape(COUT, KKC)
    wc_aug = jnp.concatenate(
        [wc_t, bconv.reshape(COUT, 1),
         jnp.zeros((COUT, KKC_PAD - KKC - 1), jnp.float32)], axis=1)      # (COUT, KKC_PAD)

    # head: fold the global-average-pool 1/(H*W) into the weight, pack bias as last row.
    wf_packed = jnp.concatenate(
        [jnp.transpose(wfc, (1, 0)) * (1.0 / HW),
         bfc.reshape(1, NUM_CLASSES)], axis=0)                            # (COUT+1, NC)

    # ---- Pallas kernel: one fused invocation, 3 VMEM-resident operands ----
    out = pl.pallas_call(
        _fused_model_kernel,
        out_shape=jax.ShapeDtypeStruct((b, NUM_CLASSES), jnp.float32),
        in_specs=[pl.BlockSpec(memory_space=pltpu.MemorySpace.VMEM)] * 3,
        out_specs=pl.BlockSpec(memory_space=pltpu.MemorySpace.VMEM),
    )(p_aug, wc_aug, wf_packed)
    return out


def _reference(x_nchw, wconv, bconv, wfc, bfc):
    """Pure-JAX reference of the same inner model (for correctness check)."""
    y = lax.conv_general_dilated(
        x_nchw, wconv, window_strides=(1, 1), padding="SAME",
        dimension_numbers=("NCHW", "OIHW", "NCHW"))
    y = y + bconv.reshape(1, COUT, 1, 1)
    y = jnp.maximum(y, 0.0)
    pooled = jnp.mean(y, axis=(2, 3))                                  # (B, COUT)
    return pooled @ wfc.T + bfc


if __name__ == "__main__":
    key = jax.random.PRNGKey(0)
    k_x, k_wc, k_bc, k_wf, k_bf = jax.random.split(key, 5)

    x = jax.random.normal(k_x, (B, CIN, H, W), dtype=jnp.float32)
    wconv = jax.random.normal(k_wc, (COUT, CIN, K, K), dtype=jnp.float32) * 0.1
    bconv = jax.random.normal(k_bc, (COUT,), dtype=jnp.float32) * 0.1
    wfc = jax.random.normal(k_wf, (NUM_CLASSES, COUT), dtype=jnp.float32) * 0.1
    bfc = jax.random.normal(k_bf, (NUM_CLASSES,), dtype=jnp.float32) * 0.1

    out = custom_adv_model_forward(x, wconv, bconv, wfc, bfc)
    out = jax.block_until_ready(out)

    ref = jax.block_until_ready(_reference(x, wconv, bconv, wfc, bfc))
    assert out.shape == (B, NUM_CLASSES)
    assert jnp.allclose(out, ref, atol=1e-4, rtol=1e-4), (out, ref)

    print("KERNEL_OK")
</pallas_src>

<mosaic_0001>
module attributes {stable_mosaic.version = 11 : i64} {
  func.func @_fused_model_kernel(%arg0: memref<40x512xf32, #tpu.memory_space<vmem>>, %arg1: memref<8x40xf32, #tpu.memory_space<vmem>>, %arg2: memref<9x10xf32, #tpu.memory_space<vmem>>, %arg3: memref<2x10xf32, #tpu.memory_space<vmem>>) attributes {dimension_semantics = [], scalar_prefetch = 0 : i64, scratch_operands = 0 : i64, tpu.core_type = #tpu.core_type<tc>} {
    %c0 = arith.constant 0 : index
    %c0_0 = arith.constant 0 : index
    %0 = vector.load %arg1[%c0, %c0_0] : memref<8x40xf32, #tpu.memory_space<vmem>>, vector<8x40xf32>
    %c0_1 = arith.constant 0 : index
    %c0_2 = arith.constant 0 : index
    %1 = vector.load %arg0[%c0_1, %c0_2] : memref<40x512xf32, #tpu.memory_space<vmem>>, vector<40x512xf32>
    %cst = arith.constant dense<0.000000e+00> : vector<8x512xf32>
    %2 = tpu.matmul %0, %1, %cst {dimension_numbers = #tpu.dot_dimension_numbers<[1], [0], [0], [1], [0, 0, 1, 1], [], []>} : vector<8x40xf32>, vector<40x512xf32>, vector<8x512xf32> -> vector<8x512xf32>
    %cst_3 = arith.constant 0.000000e+00 : f32
    %3 = vector.broadcast %cst_3 : f32 to vector<8x512xf32>
    %4 = arith.maximumf %2, %3 : vector<8x512xf32>
    %5 = tpu.iota {dimensions = array<i32: 1>} : vector<2x512xi32>
    %6 = tpu.iota {dimensions = array<i32: 0>} : vector<2x512xi32>
    %c256_i32 = arith.constant 256 : i32
    %7 = vector.broadcast %c256_i32 : i32 to vector<2x512xi32>
    %8 = arith.muli %6, %7 : vector<2x512xi32>
    %9 = arith.cmpi sge, %5, %8 : vector<2x512xi32>
    %c256_i32_4 = arith.constant 256 : i32
    %10 = vector.broadcast %c256_i32_4 : i32 to vector<2x512xi32>
    %11 = arith.addi %8, %10 : vector<2x512xi32>
    %12 = arith.cmpi slt, %5, %11 : vector<2x512xi32>
    %13 = arith.andi %9, %12 : vector<2x512xi1>
    %14 = arith.extui %13 : vector<2x512xi1> to vector<2x512xi32>
    %15 = arith.sitofp %14 : vector<2x512xi32> to vector<2x512xf32>
    %cst_5 = arith.constant dense<0.000000e+00> : vector<2x8xf32>
    %16 = tpu.matmul %15, %4, %cst_5 {dimension_numbers = #tpu.dot_dimension_numbers<[1], [1], [0], [0], [0, 0, 1, 0], [], []>} : vector<2x512xf32>, vector<8x512xf32>, vector<2x8xf32> -> vector<2x8xf32>
    %c0_6 = arith.constant 0 : index
    %c0_7 = arith.constant 0 : index
    %17 = vector.load %arg2[%c0_6, %c0_7] : memref<9x10xf32, #tpu.memory_space<vmem>>, vector<8x10xf32>
    %c8 = arith.constant 8 : index
    %c0_8 = arith.constant 0 : index
    %18 = vector.load %arg2[%c8, %c0_8] : memref<9x10xf32, #tpu.memory_space<vmem>>, vector<1x10xf32>
    %cst_9 = arith.constant dense<0.000000e+00> : vector<2x10xf32>
    %19 = tpu.matmul %16, %17, %cst_9 {dimension_numbers = #tpu.dot_dimension_numbers<[1], [0], [0], [1], [0, 0, 1, 1], [], []>} : vector<2x8xf32>, vector<8x10xf32>, vector<2x10xf32> -> vector<2x10xf32>
    %20 = vector.broadcast %18 : vector<1x10xf32> to vector<2x10xf32>
    %21 = arith.addf %19, %20 : vector<2x10xf32>
    %c0_10 = arith.constant 0 : index
    %c0_11 = arith.constant 0 : index
    %22 = vector.load %arg3[%c0_10, %c0_11] : memref<2x10xf32, #tpu.memory_space<vmem>>, vector<2x10xf32>
    tpu.vector_store %arg3[%c0_10, %c0_11], %21 {strides = array<i32>} : memref<2x10xf32, #tpu.memory_space<vmem>>, vector<2x10xf32>,
    return
  }
}

</mosaic_0001>

<bundles_post_ra>
// kernel: custom_adv_model_forward.1
= control target key start
LH: loop header
LB: loop body
LE: loop exit
PB: predicated region body
PF: predicated region fallthrough
CT: control target
= control target key end

     0   :  { %v516_v7 = vmov 0.0   ;;  %s643_s0 = inlined_call_operand.vmem [shape: f32[40,512], index: 0, kind: input, shape index: {}]   ;;  %s644_s1 = inlined_call_operand.vmem [shape: f32[8,40], index: 1, kind: input, shape index: {}]   ;;  %s645_s2 = inlined_call_operand.vmem [shape: f32[9,10], index: 2, kind: input, shape index: {}]   ;;  %s646_s3 = inlined_call_operand.hbm [shape: f32[2,10], index: 3, kind: output, shape index: {}]  }
   0x1   :  { %v17_v0 = vld [vmem:[%s643_s0 + $0x8] sm:$0xff]  ;;  %v16_v2 = vld [vmem:[%s643_s0] sm:$0xff]  ;;  %v19_v5 = vld [vmem:[%s643_s0 + $0x18] sm:$0xff]  ;;  %104 = vmatprep.mubr.f32.mxu0 %v516_v7  ;;  %175 = vmatprep.mubr.f32.mxu1 %v516_v7 }
   0x2   :  { %v21_v1 = vld [vmem:[%s643_s0 + $0x28] sm:$0xff]  ;;  %v20_v4 = vld [vmem:[%s643_s0 + $0x20] sm:$0xff]  ;;  %v23_v6 = vld [vmem:[%s643_s0 + $0x38] sm:$0xff] }
   0x3   :  { %v470_v3 = vpack.c.bf16 %v21_v1, %v17_v0  ;;  %v472_v8 = vpack.c.bf16 %v20_v4, %v16_v2  ;;  %v478_v9 = vpack.c.bf16 %v23_v6, %v19_v5  ;;  %v25_v10 = vld [vmem:[%s643_s0 + $0x48] sm:$0xff]  ;;  %v18_v12 = vld [vmem:[%s643_s0 + $0x10] sm:$0xff]  ;;  %v24_v15 = vld [vmem:[%s643_s0 + $0x40] sm:$0xff] }
   0x4   :  { %v29_v11 = vld [vmem:[%s643_s0 + $0x68] sm:$0xff]  ;;  %v22_v14 = vld [vmem:[%s643_s0 + $0x30] sm:$0xff]  ;;  %v28_v16 = vld [vmem:[%s643_s0 + $0x60] sm:$0xff] }
   0x5   :  { %471 = vmatprep.subr.bf16.mxu0 %v470_v3  ;;  %v474_v13 = vpack.c.bf16 %v29_v11, %v25_v10  ;;  %479 = vmatprep.subr.bf16.mxu1 %v478_v9  ;;  %v480_v17 = vpack.c.bf16 %v22_v14, %v18_v12  ;;  %v476_v18 = vpack.c.bf16 %v28_v16, %v24_v15  ;;  %v27_v19 = vld [vmem:[%s643_s0 + $0x58] sm:$0xff]  ;;  %v26_v22 = vld [vmem:[%s643_s0 + $0x50] sm:$0xff]  ;;  %v33_v24 = vld [vmem:[%s643_s0 + $0x88] sm:$0xff] }
   0x6   :  { %473 = vmatpush1.bf16.msra.mxu0 %v472_v8  ;;  %v31_v20 = vld [vmem:[%s643_s0 + $0x78] sm:$0xff]  ;;  %v30_v23 = vld [vmem:[%s643_s0 + $0x70] sm:$0xff] }
   0x7   :  { %475 = vmatprep.subr.bf16.mxu0 %v474_v13  ;;  %v482_v21 = vpack.c.bf16 %v31_v20, %v27_v19  ;;  %481 = vmatpush1.bf16.msra.mxu1 %v480_v17  ;;  %v484_v25 = vpack.c.bf16 %v30_v23, %v26_v22 }
   0x9   :  { %483 = vmatprep.subr.bf16.mxu1 %v482_v21 }
   0xa   :  { %8 = vsyncpa [#allocation3], 0  ;;  %477 = vmatpush1.bf16.msra.mxu0 %v476_v18  ;;  %v35_v26 = vld [vmem:[%s643_s0 + $0x98] sm:$0xff]  ;;  %v32_v27 = vld [vmem:[%s643_s0 + $0x80] sm:$0xff]  ;;  %vm36_vm0 = vcmask 326656   ;;  %v186_v30 = vlaneseq  ;;  %v517_v36 = vmov 1.0  }
   0xb   :  { %48 = vmatprep.subr.mxu0 %v33_v24  ;;  %485 = vmatpush1.bf16.msra.mxu1 %v484_v25  ;;  %v15_v28 = vld [vmem:[%s644_s1] sm:$0xff]  ;;  %v34_v29 = vld [vmem:[%s643_s0 + $0x90] sm:$0xff]  ;;  %vm518_vm13 = vmmov 0   ;;  %vm361_vm14 = vcmask 64512   ;;  %v461_v53 = vld [vmem:[%s645_s2 + $0x8] ss:$0 sm:$0xff] }
   0xc   :  { %119 = vmatprep.subr.mxu1 %v35_v26  ;;  %v192_v31 = vshrl.u32 %v186_v30, 7  ;;  %v187_v32 = vand.u32 127, %v186_v30  ;;  %v355_v42 = vld [vmem:[%s645_s2] sm:$0xff]  ;;  %s519_s29 = smov [#allocation2]   ;;  %vm435_vm15 = vcmask 74752  }
   0xd   :  { %s443_s30 = sshll.u32 %s519_s29, 4  ;;  %s444_s30 = int_to_ptr.vmem [resolvable:$true] %s443_s30 }
   0xe   :  { %49 = vmatpush1.msra.mxu0 %v32_v27  ;;  %v193_v33 = vmul.u32 256, %v192_v31  ;;  %v188_v34 = vadd.s32 128, %v187_v32  ;;  %v190_v38 = vadd.s32 384, %v187_v32  ;;  %v189_v39 = vadd.s32 256, %v187_v32  ;;  %s492_s4 = scalar_lea.vmem %s444_s30, 32  ;;  %p497_p1 = scmp.lt.s32.totalorder %s444_s30, %s444_s30 }
   0xf   :  { %451 = vmatmul.mubr.msk.f32.vlgmr.msra.gmra.mrb[0].mxu0 %vm36_vm0, %v15_v28  ;;  %120 = vmatpush1.msra.mxu1 %v34_v29  ;;  %p493_p0 = scmp.ne.s32.totalorder %s444_s30, %s492_s4  ;;  %p498_p2 = scmp.lt.s32.totalorder %s492_s4, %s492_s4 }
  0x10   :  { %452 = vmatmul.mubr.msk.f32.vlgmr.msra.gmra.mrb[0].mxu1 %vm36_vm0, %v15_v28  ;;  %465 = vmatprep.subr.mxu1 %v516_v7  ;;  %v198_v35 = vadd.s32 256, %v193_v33  ;;  %vm195_vm1 = vcmp.ge.s32.totalorder %v188_v34, %v193_v33  ;;  %vm194_vm4 = vcmp.ge.s32.totalorder %v187_v32, %v193_v33  ;;  %vm197_vm7 = vcmp.ge.s32.totalorder %v190_v38, %v193_v33 }
  0x11   :  { %vm196_vm9 = vcmp.ge.s32.totalorder %v189_v39, %v193_v33  ;;  %466 = vmatpush3.msra.mxu1 %v355_v42  ;;  %467 = vmatprep.mubr.msk.f32.mxu1 %vm518_vm13, %v516_v7  ;;  %p499_p3 = por %p498_p2, %p497_p1 }
  0x12   :  { %vm200_vm2 = vcmp.lt.s32.totalorder %v188_v34, %v198_v35  ;;  %vm199_vm5 = vcmp.lt.s32.totalorder %v187_v32, %v198_v35  ;;  %vm202_vm8 = vcmp.lt.s32.totalorder %v190_v38, %v198_v35  ;;  %vm201_vm10 = vcmp.lt.s32.totalorder %v189_v39, %v198_v35 }
  0x13   :  { %vm204_vm3 = vmand %vm195_vm1, %vm200_vm2  ;;  %p500_p4 = pnand %p499_p3, %p493_p0 }
  0x14   :  { %457 = vmatprep.mubr.msk.f32.mxu0 %vm204_vm3, %v517_v36  ;;  %vm606_vm6 = vmand %vm194_vm4, %vm199_vm5 }
  0x15   :  { %vm610_vm11 = vmand %vm197_vm7, %vm202_vm8 }
  0x16   :  { %vm614_vm12 = vmand %vm196_vm9, %vm201_vm10 }
  0xe2   :  { %v106_v43 = vpop.f32.mrb[0].mxu0 }
  0xe3   :  { %v108_v44 = vpop.f32.mrb[1].mxu0  ;;  %v177_v46 = vpop.f32.mrb[0].mxu1  ;;  %v182_v47 = vmax.f32 %v106_v43, 0.0 }
  0xe4   :  { %v183_v45 = vmax.f32 %v108_v44, 0.0  ;;  %v179_v48 = vpop.f32.mrb[1].mxu1  ;;  %v184_v50 = vmax.f32 %v177_v46, 0.0 }
  0xe5   :  { %v185_v49 = vmax.f32 %v179_v48, 0.0 }
  0xe6   :  { %215 = vmatprep.subr.mxu0 %v183_v45 }
  0xe7   :  { %216 = vmatpush1.xpose.msra.mxu0 %v182_v47 }
  0xe8   :  { %285 = vmatprep.subr.mxu0 %v185_v49 }
  0xea   :  { %458 = vmatmul.mubr.msk.f32.vlgmr.msra.gmra.mrb[2].mxu0 %vm606_vm6, %v517_v36 }
  0xeb   :  { %286 = vmatpush1.xpose.msra.mxu0 %v184_v50  ;;  %459 = vmatprep.mubr.msk.f32.mxu0 %vm610_vm11, %v517_v36 }
  0xf2   :  { %460 = vmatmul.mubr.msk.f32.vlgmr.msra.gmra.mrb[2].mxu0 %vm614_vm12, %v517_v36 }
 0x1c5   :  { %v351_v51 = vpop.f32.mrb[2].mxu0 }
 0x1c6   :  { %v353_v52 = vpop.f32.mrb[3].mxu0  ;;  %468 = vmatmul.mubr.msk.f32.vlgmr.msra.gmra.mrb[2].mxu1 %vm361_vm14, %v351_v51 }
 0x299   :  { %v431_v54 = vpop.f32.mrb[2].mxu1 }
 0x29a   :  { %v432_v55 = vadd.f32 %v461_v53, %v431_v54  ;;  %v469_v56 = vpop.f32.mrb[3].mxu1 }
 0x29c   :  { %436 = vst.msk [vmem:[#allocation2] sm:$0x3] %vm435_vm15, %v432_v55 }
 0x29d   :  { %503 = shalt.err (!%p500_p4)
}
 0x29e   :  { %s504_s7 = scalar_lea.hbm %s646_s3, 32 }
 0x29f   :  { %p505_p5 = scmp.ne.s32.totalorder %s646_s3, %s504_s7  ;;  %p508_p6 = scmp.lt.u32.totalorder %s504_s7, %s646_s3 }
 0x2a1   :  { %p510_p7 = pnand %p508_p6, %p505_p5 }
 0x2a3   :  { %513 = shalt.err (!%p510_p7)
}
 0x2a4   :  { %446 = dma.vmem_to_hbm [thread:$0]  %s444_s30, 32, %s646_s3, [#allocation3]  }
 0x2a5   :  { %514 = dma.done.wait [#allocation3], 32  }
 0x2a6   :  { %515 = vsyncadd [#allocation3], 4294967264 }
 0x2a7   :  { %450 = vsyncpa [#allocation3], 1 }

</bundles_post_ra>
